<compile_context>
chip_gen: v6e
topology: v6e:2x2x1
jax: 0.10.0
libtpu: 0.0.40
codegen_flags: <defaults>
</compile_context>

<pallas_src>
import functools

import jax
import jax.numpy as jnp
from jax.experimental import pallas as pl
from jax.experimental.pallas import tpu as pltpu


def _round_up(x, m):
    return ((x + m - 1) // m) * m


def _pick_chunk(ts, cs_max):
    """Largest multiple of 16 that divides ts and is <= cs_max (>=16)."""
    q = ts // 16
    best = 16
    for d in range(1, q + 1):
        if q % d == 0 and 16 * d <= cs_max:
            best = 16 * d
    return best


# ----------------------------- Pallas kernels -----------------------------

def _linear_kernel_out(x_ref, w_ref, b_ref, o_ref, *, activation):
    # f32 output: accumulate directly into the resident output block (no scratch).
    k = pl.program_id(2)

    @pl.when(k == 0)
    def _():
        o_ref[...] = jnp.zeros_like(o_ref)

    o_ref[...] += jnp.dot(x_ref[...], w_ref[...],
                          preferred_element_type=jnp.float32)

    @pl.when(k == pl.num_programs(2) - 1)
    def _():
        y = o_ref[...] + b_ref[...]
        if activation == "tanh":
            y = jnp.tanh(y)
        o_ref[...] = y


def _linear_kernel_acc(x_ref, w_ref, b_ref, o_ref, acc_ref, *, activation):
    # bf16 (or other narrow) output: f32 VMEM accumulator, cast on last-k writeback.
    k = pl.program_id(2)

    @pl.when(k == 0)
    def _():
        acc_ref[...] = jnp.zeros_like(acc_ref)

    acc_ref[...] += jnp.dot(x_ref[...], w_ref[...],
                            preferred_element_type=jnp.float32)

    @pl.when(k == pl.num_programs(2) - 1)
    def _():
        y = acc_ref[...] + b_ref[...]
        if activation == "tanh":
            y = jnp.tanh(y)
        o_ref[...] = y.astype(o_ref.dtype)


def _masked_max_head_kernel(h_ref, m_ref, w_ref, b_ref, o_ref, acc_ref,
                            *, n_chunks, cs):
    # h: [ts, Hp] bf16, m: [ts, 1] f32 (1 valid / 0 masked+pad),
    # w: [Hp, Lp] bf16, b: [1, Lp] f32 -> o: [1, Lp] f32 (max over S).
    # PyTorch-exact: where(mask, h@W + b, -1e7), then running max over S tiles.
    si = pl.program_id(1)

    @pl.when(si == 0)
    def _():
        acc_ref[...] = jnp.full(acc_ref.shape, -3.0e38, dtype=acc_ref.dtype)

    def body(c, running):
        r0 = pl.multiple_of(c * cs, cs)
        logits = jnp.dot(h_ref[pl.ds(r0, cs), :], w_ref[...],
                         preferred_element_type=jnp.float32)      # [cs, Lp]
        logits = logits + b_ref[...]
        vals = jnp.where(m_ref[pl.ds(r0, cs), :] > 0.5, logits, -10000000.0)
        return jnp.maximum(running, jnp.max(vals, axis=0, keepdims=True))

    init = jnp.full(acc_ref.shape, -3.0e38, dtype=jnp.float32)
    tile_max = jax.lax.fori_loop(0, n_chunks, body, init, unroll=True)
    acc_ref[...] = jnp.maximum(acc_ref[...], tile_max)

    @pl.when(si == pl.num_programs(1) - 1)
    def _():
        o_ref[...] = acc_ref[...].astype(o_ref.dtype)


def _mlsm_loss_kernel(x_ref, y_ref, o_ref):
    # torch.nn.MultiLabelSoftMarginLoss: mean over classes, mean over batch
    # (equal here since every row has the same class count). f32 throughout.
    x = x_ref[...].astype(jnp.float32)
    y = y_ref[...].astype(jnp.float32)

    def softplus(v):
        return jnp.maximum(v, 0.0) + jnp.log1p(jnp.exp(-jnp.abs(v)))

    per_elem = y * softplus(-x) + (1.0 - y) * softplus(x)
    o_ref[...] = jnp.broadcast_to(jnp.mean(per_elem), (1, 1))


# ----------------------------- kernel wrappers -----------------------------

class PallasLinear:
    """y = x @ w + b (optional tanh). Weights padded/cast to bf16 once at init."""

    def __init__(self, w, b, activation=None, out_dtype=jnp.float32):
        K, N = w.shape
        self.K, self.N = K, N
        self.activation = activation
        self.out_dtype = out_dtype

        Np = _round_up(N, 128)
        self.tn = Np if Np <= 512 else 512          # keep >=2 N blocks for big L (v7x)
        Np = _round_up(Np, self.tn)
        Kp = _round_up(K, 128)
        self.tk = Kp if Kp <= 1024 else 1024
        Kp = _round_up(Kp, self.tk)
        self.Kp, self.Np = Kp, Np

        # cached, padded, MXU-ready operands (built once)
        self.w_p = jnp.zeros((Kp, Np), jnp.bfloat16).at[:K, :N].set(
            w.astype(jnp.bfloat16))
        self.b_p = jnp.zeros((1, Np), jnp.float32).at[0, :N].set(
            b.astype(jnp.float32))

    def __call__(self, x):
        lead = x.shape[:-1]
        K = x.shape[-1]
        x2 = x.reshape(-1, K)
        M = x2.shape[0]

        tm = min(512, _round_up(M, 16))             # bf16-native 16-row sublane packing
        Mp = _round_up(M, tm)

        if M == Mp and K == self.Kp and x2.dtype == jnp.bfloat16:
            x_p = x2                                # aligned fast path: no pad copy
        else:
            x_p = jnp.zeros((Mp, self.Kp), jnp.bfloat16).at[:M, :K].set(
                x2.astype(jnp.bfloat16))

        grid = (Mp // tm, self.Np // self.tn, self.Kp // self.tk)
        use_acc = self.out_dtype != jnp.float32
        kernel = functools.partial(
            _linear_kernel_acc if use_acc else _linear_kernel_out,
            activation=self.activation)
        scratch = [pltpu.VMEM((tm, self.tn), jnp.float32)] if use_acc else []

        out = pl.pallas_call(
            kernel,
            grid_spec=pltpu.PrefetchScalarGridSpec(
                num_scalar_prefetch=0,
                grid=grid,
                in_specs=[
                    pl.BlockSpec((tm, self.tk), lambda i, j, k: (i, k)),
                    pl.BlockSpec((self.tk, self.tn), lambda i, j, k: (k, j)),
                    pl.BlockSpec((1, self.tn), lambda i, j, k: (0, j)),
                ],
                out_specs=pl.BlockSpec((tm, self.tn), lambda i, j, k: (i, j)),
                scratch_shapes=scratch,
            ),
            out_shape=jax.ShapeDtypeStruct((Mp, self.Np), self.out_dtype),
            compiler_params=pltpu.CompilerParams(
                dimension_semantics=("parallel", "parallel", "arbitrary")),
        )(x_p, self.w_p, self.b_p)
        return out[:M, :self.N].reshape(*lead, self.N)


class PallasMaskedMaxHead:
    """Fused: max_S( where(mask, hidden @ w + b, -1e7) ), per batch row."""

    def __init__(self, w, b):
        H, L = w.shape
        self.H, self.L = H, L
        self.Hp = _round_up(H, 128)
        self.Lp = _round_up(L, 128)
        self.w_p = jnp.zeros((self.Hp, self.Lp), jnp.bfloat16).at[:H, :L].set(
            w.astype(jnp.bfloat16))
        self.b_p = jnp.zeros((1, self.Lp), jnp.float32).at[0, :L].set(
            b.astype(jnp.float32))

    def __call__(self, hidden, mask):
        B, S, H = hidden.shape
        ts = min(128, _round_up(S, 16))
        Sp = _round_up(S, ts)
        # cap the live f32 logits chunk at ~128 KiB (cs * Lp * 4 bytes)
        cs_max = max(16, (32768 // self.Lp) // 16 * 16)
        cs = _pick_chunk(ts, cs_max)
        n_chunks = ts // cs

        if S == Sp and H == self.Hp and hidden.dtype == jnp.bfloat16:
            h_p = hidden                            # aligned bf16 fast path
        else:
            h_p = jnp.zeros((B, Sp, self.Hp), jnp.bfloat16).at[:, :S, :H].set(
                hidden.astype(jnp.bfloat16))
        m_p = jnp.zeros((B, Sp, 1), jnp.float32).at[:, :S, 0].set(
            mask.astype(jnp.float32))

        grid = (B, Sp // ts)                        # L kept whole: hidden streamed once
        out = pl.pallas_call(
            functools.partial(_masked_max_head_kernel, n_chunks=n_chunks, cs=cs),
            grid_spec=pltpu.PrefetchScalarGridSpec(
                num_scalar_prefetch=0,
                grid=grid,
                in_specs=[
                    pl.BlockSpec((None, ts, self.Hp), lambda bi, si: (bi, si, 0)),
                    pl.BlockSpec((None, ts, 1), lambda bi, si: (bi, si, 0)),
                    pl.BlockSpec((self.Hp, self.Lp), lambda bi, si: (0, 0)),
                    pl.BlockSpec((1, self.Lp), lambda bi, si: (0, 0)),
                ],
                out_specs=pl.BlockSpec((None, 1, self.Lp), lambda bi, si: (bi, 0, 0)),
                scratch_shapes=[pltpu.VMEM((1, self.Lp), jnp.float32)],
            ),
            out_shape=jax.ShapeDtypeStruct((B, 1, self.Lp), jnp.float32),
            compiler_params=pltpu.CompilerParams(
                dimension_semantics=("parallel", "arbitrary")),
        )(h_p, m_p, self.w_p, self.b_p)
        return out[:, 0, :self.L]


def pallas_mlsm_loss(logits, labels):
    # Tiny [B, L] inputs: single block, explicitly pinned to VMEM.
    out = pl.pallas_call(
        _mlsm_loss_kernel,
        in_specs=[pl.BlockSpec(memory_space=pltpu.MemorySpace.VMEM),
                  pl.BlockSpec(memory_space=pltpu.MemorySpace.VMEM)],
        out_specs=pl.BlockSpec(memory_space=pltpu.MemorySpace.VMEM),
        out_shape=jax.ShapeDtypeStruct((1, 1), jnp.float32),
    )(logits.astype(jnp.float32), labels.astype(jnp.float32))
    return out[0, 0]


# ------------------------------- the module -------------------------------

def _init_linear(key, fan_in, fan_out):
    kw, kb = jax.random.split(key)
    bound = 1.0 / jnp.sqrt(jnp.float32(fan_in))
    w = jax.random.uniform(kw, (fan_in, fan_out), jnp.float32, -bound, bound)
    b = jax.random.uniform(kb, (fan_out,), jnp.float32, -bound, bound)
    return w, b


class MultiSourceForSememePrediction:
    def __init__(self, n_labels, text_hidden_size, img_hidden_size, dropout_p,
                 vocab_size=64, key=None):
        self.n_labels = n_labels
        self.dropout_p = dropout_p  # dropout is identity in eval mode
        H, I, L = text_hidden_size, img_hidden_size, n_labels
        keys = jax.random.split(key, 10)

        # stub text encoder (see TODO(synk) above); bf16 outputs feed the MXU heads
        self.emb = jax.random.normal(keys[0], (vocab_size, H), jnp.float32) * 0.02
        w, b = _init_linear(keys[1], H, H)
        self.enc = PallasLinear(w, b, activation="tanh", out_dtype=jnp.bfloat16)
        w, b = _init_linear(keys[2], H, H)
        self.pool = PallasLinear(w, b, activation="tanh", out_dtype=jnp.bfloat16)

        # classification heads (shapes match the PyTorch __init__); f32 logits out
        w, b = _init_linear(keys[3], H, L)
        self.text_pooler_head = PallasLinear(w, b)
        w, b = _init_linear(keys[4], H, L)
        self.text_max_head = PallasMaskedMaxHead(w, b)
        w, b = _init_linear(keys[5], H, L)
        self.text_pre_head = PallasLinear(w, b)
        w, b = _init_linear(keys[6], I, L)
        self.img_head = PallasLinear(w, b)
        w, b = _init_linear(keys[7], 2048, I)
        self.img_enc = PallasLinear(w, b, out_dtype=jnp.bfloat16)  # feeds cls head
        w, b = _init_linear(keys[8], H + I, L)
        self.cls_head = PallasLinear(w, b)

    # --- stub XLM-R encoder: embedding + tanh dense; pooler = tanh(W @ h_cls) ---
    def _text_encoder(self, text_ids, text_mask):
        emb = self.emb[text_ids]                                   # gather (glue)
        last_hidden = self.enc(emb)                                # bf16 [B,S,H]
        pooler = self.pool(last_hidden[:, 0, :])                   # bf16 [B,H]
        return last_hidden, pooler

    def forward(self, mode, text_ids, text_mask, img_ids=None, labels=None,
                mask_idx=None):
        # dropout: identity (eval mode)
        if mode == "pretrain":
            last_hidden, _ = self._text_encoder(text_ids, text_mask)
            B, S, H = last_hidden.shape
            idx = jnp.broadcast_to(mask_idx.reshape(B, 1, 1), (B, 1, H))
            gathered = jnp.take_along_axis(last_hidden, idx, axis=1)[:, 0, :]
            output = self.text_pre_head(gathered)
        elif mode == "train_img":
            output = self.img_head(img_ids)
        elif mode == "train_text_with_pooler_output":
            _, pooler = self._text_encoder(text_ids, text_mask)
            output = self.text_pooler_head(pooler)
        elif mode == "train_text_with_last_hidden_state":
            last_hidden, _ = self._text_encoder(text_ids, text_mask)
            output = self.text_max_head(last_hidden, text_mask)
        elif mode == "train_with_multi_source":
            _, pooler = self._text_encoder(text_ids, text_mask)
            cat = jnp.concatenate(
                [pooler.astype(jnp.float32), img_ids.astype(jnp.float32)], axis=1)
            output = self.cls_head(cat)
        elif mode == "train_with_multi_source_pro":
            _, pooler = self._text_encoder(text_ids, text_mask)
            img_out = self.img_enc(img_ids)                        # bf16
            cat = jnp.concatenate([pooler, img_out], axis=1)       # bf16
            output = self.cls_head(cat)
        else:
            raise ValueError(f"unknown mode {mode}")

        # TODO(synk): torch.sort(descending=True) full sort kept as plain-JAX argsort.
        indice = jnp.argsort(-output, axis=-1)
        loss = pallas_mlsm_loss(output, labels)
        return loss, output, indice


# ---------------------------------- main -----------------------------------

if __name__ == "__main__":
    B, S = 2, 8
    n_labels, text_hidden, img_hidden = 8, 32, 16
    vocab = 64

    model = MultiSourceForSememePrediction(
        n_labels=n_labels, text_hidden_size=text_hidden,
        img_hidden_size=img_hidden, dropout_p=0.1,
        vocab_size=vocab, key=jax.random.PRNGKey(0),
    )

    k1, k2, k3, k4 = jax.random.split(jax.random.PRNGKey(0), 4)
    text_ids = jax.random.randint(k1, (B, S), 0, vocab)
    text_mask = jnp.concatenate(
        [jnp.ones((B, 5), jnp.int32), jnp.zeros((B, 3), jnp.int32)], axis=1)
    labels = jax.random.bernoulli(k2, 0.3, (B, n_labels)).astype(jnp.float32)
    img_feat_small = jax.random.normal(k3, (B, img_hidden), jnp.float32)
    img_feat_2048 = jax.random.normal(k4, (B, 2048), jnp.float32)

    # masked-max-over-sequence head
    loss1, out1, idx1 = model.forward(
        "train_text_with_last_hidden_state", text_ids, text_mask, labels=labels)
    jax.block_until_ready((loss1, out1, idx1))

    # multi-source-pro: 2048-d img features -> img encoder head -> concat -> head
    loss2, out2, idx2 = model.forward(
        "train_with_multi_source_pro", text_ids, text_mask,
        img_ids=img_feat_2048, labels=labels)
    jax.block_until_ready((loss2, out2, idx2))

    # plain img head
    loss3, out3, idx3 = model.forward(
        "train_img", text_ids, text_mask, img_ids=img_feat_small, labels=labels)
    jax.block_until_ready((loss3, out3, idx3))

    print("KERNEL_OK")
</pallas_src>

<mosaic_0001>
module attributes {stable_mosaic.version = 11 : i64} {
  func.func @_linear_kernel_acc(%arg0: i32, %arg1: i32, %arg2: i32, %arg3: memref<16x128xbf16, #tpu.memory_space<vmem>>, %arg4: memref<128x128xbf16, #tpu.memory_space<vmem>>, %arg5: memref<1x128xf32, #tpu.memory_space<vmem>>, %arg6: memref<16x128xbf16, #tpu.memory_space<vmem>>, %arg7: memref<16x128xf32, #tpu.memory_space<vmem>>) attributes {dimension_semantics = [#tpu.dimension_semantics<parallel>, #tpu.dimension_semantics<parallel>, #tpu.dimension_semantics<arbitrary>], iteration_bounds = array<i64: 1, 1, 1>, scalar_prefetch = 0 : i64, scratch_operands = 1 : i64, tpu.core_type = #tpu.core_type<tc>, window_params = [{transform_indices = @transform_0, window_bounds = array<i64: 16, 128>}, {transform_indices = @transform_1, window_bounds = array<i64: 128, 128>}, {transform_indices = @transform_2, window_bounds = array<i64: 1, 128>}, {transform_indices = @transform_3, window_bounds = array<i64: 16, 128>}]} {
    %c0_i32 = arith.constant 0 : i32
    %0 = arith.cmpi eq, %arg2, %c0_i32 : i32
    %1 = arith.extui %0 : i1 to i32
    %c0_i32_0 = arith.constant 0 : i32
    %2 = arith.cmpi ne, %1, %c0_i32_0 : i32
    scf.if %2 {
      %cst_10 = arith.constant 0.000000e+00 : f32
      %12 = vector.broadcast %cst_10 : f32 to vector<16x128xf32>
      %c0_11 = arith.constant 0 : index
      %c0_12 = arith.constant 0 : index
      %13 = vector.load %arg7[%c0_11, %c0_12] : memref<16x128xf32, #tpu.memory_space<vmem>>, vector<16x128xf32>
      tpu.vector_store %arg7[%c0_11, %c0_12], %12 {strides = array<i32>} : memref<16x128xf32, #tpu.memory_space<vmem>>, vector<16x128xf32>,
    } else {
    }
    %c0 = arith.constant 0 : index
    %c0_1 = arith.constant 0 : index
    %3 = vector.load %arg7[%c0, %c0_1] : memref<16x128xf32, #tpu.memory_space<vmem>>, vector<16x128xf32>
    %c0_2 = arith.constant 0 : index
    %c0_3 = arith.constant 0 : index
    %4 = vector.load %arg3[%c0_2, %c0_3] : memref<16x128xbf16, #tpu.memory_space<vmem>>, vector<16x128xbf16>
    %c0_4 = arith.constant 0 : index
    %c0_5 = arith.constant 0 : index
    %5 = vector.load %arg4[%c0_4, %c0_5] : memref<128x128xbf16, #tpu.memory_space<vmem>>, vector<128x128xbf16>
    %cst = arith.constant dense<0.000000e+00> : vector<16x128xf32>
    %6 = tpu.matmul %4, %5, %cst {dimension_numbers = #tpu.dot_dimension_numbers<[1], [0], [0], [1], [0, 0, 1, 1], [], []>} : vector<16x128xbf16>, vector<128x128xbf16>, vector<16x128xf32> -> vector<16x128xf32>
    %7 = arith.addf %3, %6 : vector<16x128xf32>
    %c0_6 = arith.constant 0 : index
    %c0_7 = arith.constant 0 : index
    %8 = vector.load %arg7[%c0_6, %c0_7] : memref<16x128xf32, #tpu.memory_space<vmem>>, vector<16x128xf32>
    tpu.vector_store %arg7[%c0_6, %c0_7], %7 {strides = array<i32>} : memref<16x128xf32, #tpu.memory_space<vmem>>, vector<16x128xf32>,
    %c0_i32_8 = arith.constant 0 : i32
    %9 = arith.cmpi eq, %arg2, %c0_i32_8 : i32
    %10 = arith.extui %9 : i1 to i32
    %c0_i32_9 = arith.constant 0 : i32
    %11 = arith.cmpi ne, %10, %c0_i32_9 : i32
    scf.if %11 {
      %c0_10 = arith.constant 0 : index
      %c0_11 = arith.constant 0 : index
      %12 = vector.load %arg7[%c0_10, %c0_11] : memref<16x128xf32, #tpu.memory_space<vmem>>, vector<16x128xf32>
      %c0_12 = arith.constant 0 : index
      %c0_13 = arith.constant 0 : index
      %13 = vector.load %arg5[%c0_12, %c0_13] : memref<1x128xf32, #tpu.memory_space<vmem>>, vector<1x128xf32>
      %14 = vector.broadcast %13 : vector<1x128xf32> to vector<16x128xf32>
      %15 = arith.addf %12, %14 : vector<16x128xf32>
      %16 = math.tanh %15 : vector<16x128xf32>
      %17 = arith.truncf %16 : vector<16x128xf32> to vector<16x128xbf16>
      %c0_14 = arith.constant 0 : index
      %c0_15 = arith.constant 0 : index
      %18 = vector.load %arg6[%c0_14, %c0_15] : memref<16x128xbf16, #tpu.memory_space<vmem>>, vector<16x128xbf16>
      tpu.vector_store %arg6[%c0_14, %c0_15], %17 {strides = array<i32>} : memref<16x128xbf16, #tpu.memory_space<vmem>>, vector<16x128xbf16>,
    } else {
    }
    return
  }
  func.func @transform_0(%arg0: i32, %arg1: i32, %arg2: i32) -> (i32, i32) {
    %c0_i32 = arith.constant 0 : i32
    return %arg0, %arg2 : i32, i32
  }
  func.func @transform_1(%arg0: i32, %arg1: i32, %arg2: i32) -> (i32, i32) {
    %c0_i32 = arith.constant 0 : i32
    return %arg2, %arg1 : i32, i32
  }
  func.func @transform_2(%arg0: i32, %arg1: i32, %arg2: i32) -> (i32, i32) {
    %c0_i32 = arith.constant 0 : i32
    %c0_i32_0 = arith.constant 0 : i32
    return %c0_i32, %arg1 : i32, i32
  }
  func.func @transform_3(%arg0: i32, %arg1: i32, %arg2: i32) -> (i32, i32) {
    %c0_i32 = arith.constant 0 : i32
    return %arg0, %arg1 : i32, i32
  }
}

</mosaic_0001>

<bundles_post_ra>
// kernel: tpu_custom_call.1
= control target key start
LH: loop header
LB: loop body
LE: loop exit
PB: predicated region body
PF: predicated region fallthrough
CT: control target
= control target key end

     0   :  { %8 = vsyncpa [#allocation4], 0  ;;  %s395_s0 = inlined_call_operand.hbm [shape: bf16[16,128], index: 0, kind: input, shape index: {}]   ;;  %s396_s1 = inlined_call_operand.hbm [shape: bf16[128,128], index: 1, kind: input, shape index: {}]   ;;  %s397_s2 = inlined_call_operand.vmem [shape: f32[1,128], index: 2, kind: input, shape index: {}]   ;;  %s398_s3 = inlined_call_operand.hbm [shape: bf16[16,128], index: 3, kind: output, shape index: {}]  }
   0x1   :  { %9 = vsyncpa [#allocation7], 0 }
   0x2   :  { %10 = vsyncpa [#allocation5], 0  ;;  %s347_s12 = smov [#allocation3]  }
   0x3   :  { %s16_s13 = sshll.u32 %s347_s12, 4  ;;  %s17_s13 = int_to_ptr.vmem [resolvable:$true] %s16_s13 }
   0x4   :  { %s289_s14 = scalar_lea.vmem %s17_s13, 128  ;;  %p294_p1 = scmp.lt.s32.totalorder %s17_s13, %s17_s13 }
   0x5   :  { %p290_p0 = scmp.ne.s32.totalorder %s17_s13, %s289_s14  ;;  %p295_p2 = scmp.lt.s32.totalorder %s289_s14, %s289_s14 }
   0x7   :  { %p296_p3 = por %p295_p2, %p294_p1 }
   0x9   :  { %p297_p4 = pnand %p296_p3, %p290_p0 }
   0xb   :  { %300 = shalt.err (!%p297_p4)
}
   0xc   :  { %s348_s15 = smov 64   ;;  %s349_s16 = smov 4  }
   0xd   :  { %22 = dma.hbm_to_vmem [thread:$0]  %s395_s0, 128, %s17_s13, [#allocation4], %s348_s15, %s348_s15, %s349_s16  }
   0xe   :  { %s350_s19 = smov [#allocation6]  }
   0xf   :  { %s28_s20 = sshll.u32 %s350_s19, 4  ;;  %s29_s20 = int_to_ptr.vmem [resolvable:$true] %s28_s20 }
  0x10   :  { %s309_s21 = scalar_lea.vmem %s29_s20, 1024  ;;  %p314_p6 = scmp.lt.s32.totalorder %s29_s20, %s29_s20 }
  0x11   :  { %p310_p5 = scmp.ne.s32.totalorder %s29_s20, %s309_s21  ;;  %p315_p7 = scmp.lt.s32.totalorder %s309_s21, %s309_s21 }
  0x13   :  { %p316_p8 = por %p315_p7, %p314_p6 }
  0x15   :  { %p317_p9 = pnand %p316_p8, %p310_p5 }
  0x17   :  { %320 = shalt.err (!%p317_p9)
}
  0x18   :  { %34 = dma.hbm_to_vmem [thread:$0]  %s396_s1, 1024, %s29_s20, [#allocation7], %s348_s15, %s348_s15, %s349_s16  }
  0x19   :  { %341 = dma.done.wait [#allocation4], 128  }
  0x1a   :  { %342 = vsyncadd [#allocation4], 4294967168 }
  0x1b   :  { %343 = dma.done.wait [#allocation7], 1024  }
  0x1c   :  { %344 = vsyncadd [#allocation7], 4294966272  ;;  %v351_v0 = vmov 0.0   ;;  %vm352_vm0 = vmmov 0   ;;  %v268_v1 = vld [vmem:[#allocation6 + $0x38] sm:$0xff]   ;;  %v269_v2 = vld [vmem:[#allocation6 + $0x30] sm:$0xff]  }
  0x1d   :  { %241 = vmatprep.subr.bf16.mxu0 %v351_v0  ;;  %257 = vmatprep.mubr.msk.bf16.mxu0 %vm352_vm0, %v351_v0  ;;  %v270_v3 = vld [vmem:[#allocation6 + $0x28] sm:$0xff]   ;;  %v271_v4 = vld [vmem:[#allocation6 + $0x20] sm:$0xff]   ;;  %v272_v5 = vld [vmem:[#allocation6 + $0x18] sm:$0xff]   ;;  %s353_s24 = smov [#allocation8]  }
  0x1e   :  { %242 = vmatpush3.bf16.msra.mxu0 %v268_v1  ;;  %v273_v6 = vld [vmem:[#allocation6 + $0x10] sm:$0xff]   ;;  %v274_v7 = vld [vmem:[#allocation6 + $0x8] sm:$0xff]   ;;  %v275_v8 = vld [vmem:[#allocation6] sm:$0xff]   ;;  %s200_s25 = sshll.u32 %s353_s24, 4  ;;  %s201_s25 = int_to_ptr.vmem [resolvable:$true] %s200_s25 }
  0x1f   :  { %243 = vmatprep.subr.bf16.mxu0 %v351_v0  ;;  %v276_v9 = vld [vmem:[#allocation3] sm:$0xff]   ;;  %s321_s26 = scalar_lea.vmem %s201_s25, 128  ;;  %p326_p11 = scmp.lt.s32.totalorder %s201_s25, %s201_s25 }
  0x20   :  { %v222_v10 = vld [vmem:[%s397_s2] ss:$0 sm:$0xff]  ;;  %p322_p10 = scmp.ne.s32.totalorder %s201_s25, %s321_s26  ;;  %p327_p12 = scmp.lt.s32.totalorder %s321_s26, %s321_s26 }
  0x22   :  { %244 = vmatpush3.bf16.msra.mxu0 %v269_v2  ;;  %p328_p13 = por %p327_p12, %p326_p11 }
  0x23   :  { %245 = vmatprep.subr.bf16.mxu0 %v351_v0 }
  0x24   :  { %p329_p0 = pnand %p328_p13, %p322_p10 }
  0x26   :  { %246 = vmatpush3.bf16.msra.mxu0 %v270_v3 }
  0x27   :  { %247 = vmatprep.subr.bf16.mxu0 %v351_v0 }
  0x2a   :  { %248 = vmatpush3.bf16.msra.mxu0 %v271_v4 }
  0x2b   :  { %249 = vmatprep.subr.bf16.mxu0 %v351_v0 }
  0x2e   :  { %250 = vmatpush3.bf16.msra.mxu0 %v272_v5 }
  0x2f   :  { %251 = vmatprep.subr.bf16.mxu0 %v351_v0 }
  0x32   :  { %252 = vmatpush3.bf16.msra.mxu0 %v273_v6 }
  0x33   :  { %253 = vmatprep.subr.bf16.mxu0 %v351_v0 }
  0x36   :  { %254 = vmatpush3.bf16.msra.mxu0 %v274_v7 }
  0x37   :  { %255 = vmatprep.subr.bf16.mxu0 %v351_v0 }
  0x3a   :  { %256 = vmatpush3.bf16.msra.mxu0 %v275_v8 }
  0x3d   :  { %258 = vmatmul.mubr.bf16.vlgmr.msra.gmra.mxu0 %v276_v9 }
  0xfd   :  { %v158_v11 = vpop.f32.mrf.mxu0 }
  0xfe   :  { %v181_v12 = vadd.f32 %v222_v10, %v158_v11 }
  0xff   :  { %v259_v13 = vpop.f32.mrf.mxu0 }
 0x100   :  { %277 = vtanh.f32 %v181_v12 }
 0x101   :  { %v161_v14 = vpop.f32.mrf.mxu0 }
 0x102   :  { %v182_v15 = vadd.f32 %v222_v10, %v161_v14 }
 0x103   :  { %v260_v16 = vpop.f32.mrf.mxu0 }
 0x104   :  { %279 = vtanh.f32 %v182_v15 }
 0x10d   :  { %v278_v17 = vpop.eup %277 }
 0x111   :  { %v280_v18 = vpop.eup %279 }
 0x112   :  { %v230_v19 = vpack.c.bf16 %v280_v18, %v278_v17 }
 0x114   :  { %231 = vst [vmem:[#allocation8] sm:$0xff] %v230_v19  }
 0x115   :  { %332 = shalt.err (!%p329_p0)
}
 0x116   :  { %206 = dma.vmem_to_hbm [thread:$0]  %s201_s25, 128, %s398_s3, [#allocation5], %s348_s15, %s348_s15, %s349_s16  }
 0x117   :  { %345 = dma.done.wait [#allocation5], 128  }
 0x118   :  { %346 = vsyncadd [#allocation5], 4294967168 }
 0x119   :  { %210 = vsyncpa [#allocation4], 1 }
 0x11a   :  { %211 = vsyncpa [#allocation7], 1 }
 0x11b   :  { %212 = vsyncpa [#allocation5], 1 }

</bundles_post_ra>
